<compile_context>
chip_gen: v6e
topology: v6e:2x2x1
jax: 0.10.0
libtpu: 0.0.40
codegen_flags: <defaults>
</compile_context>

<pallas_src>
import math

import jax
import jax.numpy as jnp
from jax.experimental import pallas as pl
from jax.experimental.pallas import tpu as pltpu


# ---------------------------------------------------------------------------
# Kernels
# ---------------------------------------------------------------------------

def _affine_relu_kernel(x_ref, w_ref, b_ref, o_ref):
    # Folded path: out = relu(x @ W_fold + b_fold), one MXU matmul per tile.
    acc = jnp.dot(x_ref[...], w_ref[...], preferred_element_type=jnp.float32)
    acc = acc + b_ref[...]                      # bias + ReLU epilogue in f32
    o_ref[...] = jnp.maximum(acc, 0.0).astype(o_ref.dtype)


def _two_linear_relu_kernel(x_ref, w1_ref, b1_ref, w2_ref, b2_ref, o_ref):
    # Unfolded path (structural fidelity): relu((x @ W1 + b1) @ W2 + b2).
    h1 = jnp.dot(x_ref[...], w1_ref[...], preferred_element_type=jnp.float32)
    h1 = h1 + b1_ref[...]
    h2 = jnp.dot(h1.astype(w2_ref.dtype), w2_ref[...],
                 preferred_element_type=jnp.float32)
    h2 = h2 + b2_ref[...]
    o_ref[...] = jnp.maximum(h2, 0.0).astype(o_ref.dtype)


# ---------------------------------------------------------------------------
# Tiling / cost helpers
# ---------------------------------------------------------------------------

def _round_up(n, m):
    return ((n + m - 1) // m) * m


def _choose_tm(B):
    """Pick a batch tile: big (amortize ~0.35us/step), multiple of 8/256,
    but keep >=2 grid blocks when B is large (dual-TC v7x megacore)."""
    if B <= 512:
        return _round_up(B, 8)            # single block; batch too small to split
    return min(2048, _round_up(pl.cdiv(B, 2), 256))


def _itemsize(dt):
    return jnp.dtype(dt).itemsize


# ---------------------------------------------------------------------------
# Parameter folding (do ONCE at parameter-load time, not per forward call)
# ---------------------------------------------------------------------------

def fold_merge_layer_params(w1, b1, w2, b2, weight_dtype=None):
    """Fold fc2(fc1(.)) into a single affine map (no nonlinearity between them).

    w1: [dim1, dim2] (fc1.weight pre-transposed), b1: [1, dim2]
    w2: [dim3, dim4] (fc2.weight pre-transposed), b2: [1, dim4]
    Returns (w_fold [dim1, dim4], b_fold [1, dim4] f32).
    """
    f32 = jnp.float32
    hi = jax.lax.Precision.HIGHEST
    w = jnp.dot(w1.astype(f32), w2.astype(f32), precision=hi)
    b = jnp.dot(b1.astype(f32), w2.astype(f32), precision=hi) + b2.astype(f32)
    if weight_dtype is None:
        weight_dtype = w1.dtype
    return w.astype(weight_dtype), b.astype(f32).reshape(1, -1)


# ---------------------------------------------------------------------------
# Forward wrappers
# ---------------------------------------------------------------------------

def merge_layer_tgn_folded(x, w_fold, b_fold, *, tm=None):
    """relu(x @ W_fold + b_fold) with pre-folded params (fast path)."""
    B, dim1 = x.shape
    d1w, dim4 = w_fold.shape
    assert d1w == dim1, "x feature dim must match folded weight input dim"
    b_fold = b_fold.reshape(1, dim4).astype(jnp.float32)

    if tm is None:
        tm = _choose_tm(B)
    tm = max(8, _round_up(tm, 8))
    grid = (pl.cdiv(B, tm),)

    isz = _itemsize(x.dtype)
    cost = pl.CostEstimate(
        flops=2 * B * dim1 * dim4,
        transcendentals=0,
        bytes_accessed=(B * (dim1 + dim4) * isz
                        + w_fold.size * _itemsize(w_fold.dtype)
                        + b_fold.size * 4),
    )

    return pl.pallas_call(
        _affine_relu_kernel,
        out_shape=jax.ShapeDtypeStruct((B, dim4), x.dtype),
        grid_spec=pltpu.PrefetchScalarGridSpec(
            num_scalar_prefetch=0,
            grid=grid,
            in_specs=[
                pl.BlockSpec((tm, dim1), lambda i: (i, 0)),     # x tile
                pl.BlockSpec((dim1, dim4), lambda i: (0, 0)),   # resident W
                pl.BlockSpec((1, dim4), lambda i: (0, 0)),      # resident b
            ],
            out_specs=pl.BlockSpec((tm, dim4), lambda i: (i, 0)),
        ),
        compiler_params=pltpu.CompilerParams(
            dimension_semantics=("parallel",),
        ),
        cost_estimate=cost,
    )(x, w_fold, b_fold)


def merge_layer_tgn(x, w1, b1, w2, b2, *, tm=None):
    """Forward of MergeLayer_tgn without pre-folding: relu(fc2(fc1(x))).

    Two MXU matmuls inside the kernel, weights grid-resident in VMEM; no
    per-call XLA matmul/pad work in the wrapper.
    """
    B, dim1 = x.shape
    dim1_w, dim2 = w1.shape
    dim3, dim4 = w2.shape
    assert dim1 == dim1_w, "x feature dim must match fc1 input dim"
    assert dim2 == dim3, "fc1 output dim must match fc2 input dim"

    b1 = b1.reshape(1, dim2).astype(jnp.float32)
    b2 = b2.reshape(1, dim4).astype(jnp.float32)

    if tm is None:
        tm = _choose_tm(B)
    tm = max(8, _round_up(tm, 8))
    grid = (pl.cdiv(B, tm),)

    isz = _itemsize(x.dtype)
    cost = pl.CostEstimate(
        flops=2 * B * dim1 * dim2 + 2 * B * dim2 * dim4,
        transcendentals=0,
        bytes_accessed=(B * (dim1 + dim4) * isz
                        + w1.size * _itemsize(w1.dtype)
                        + w2.size * _itemsize(w2.dtype)
                        + (b1.size + b2.size) * 4),
    )

    return pl.pallas_call(
        _two_linear_relu_kernel,
        out_shape=jax.ShapeDtypeStruct((B, dim4), x.dtype),
        grid_spec=pltpu.PrefetchScalarGridSpec(
            num_scalar_prefetch=0,
            grid=grid,
            in_specs=[
                pl.BlockSpec((tm, dim1), lambda i: (i, 0)),     # x tile
                pl.BlockSpec((dim1, dim2), lambda i: (0, 0)),   # resident W1
                pl.BlockSpec((1, dim2), lambda i: (0, 0)),      # resident b1
                pl.BlockSpec((dim2, dim4), lambda i: (0, 0)),   # resident W2
                pl.BlockSpec((1, dim4), lambda i: (0, 0)),      # resident b2
            ],
            out_specs=pl.BlockSpec((tm, dim4), lambda i: (i, 0)),
        ),
        compiler_params=pltpu.CompilerParams(
            dimension_semantics=("parallel",),
        ),
        cost_estimate=cost,
    )(x, w1, b1, w2, b2)


# ---------------------------------------------------------------------------
# Reference + deterministic init (matches torch module semantics)
# ---------------------------------------------------------------------------

def reference_forward(x, w1, b1, w2, b2):
    h1 = x @ w1 + b1                        # fc1
    return jnp.maximum(h1 @ w2 + b2, 0.0)   # relu(fc2(.)) — matches the module


def _xavier_normal(key, fan_out, fan_in, dtype=jnp.float32):
    # torch.nn.init.xavier_normal_ on a [fan_out, fan_in] weight.
    std = math.sqrt(2.0 / (fan_in + fan_out))
    return std * jax.random.normal(key, (fan_out, fan_in), dtype=dtype)


def _linear_bias_init(key, fan_in, fan_out, dtype=jnp.float32):
    # torch.nn.Linear default bias init: U(-1/sqrt(fan_in), 1/sqrt(fan_in)).
    bound = 1.0 / math.sqrt(fan_in)
    return jax.random.uniform(key, (1, fan_out), dtype=dtype,
                              minval=-bound, maxval=bound)


if __name__ == "__main__":
    # Small shapes consistent with the module: dim1=32, dim2=dim3=64, dim4=16.
    B, dim1, dim2, dim3, dim4 = 16, 32, 64, 64, 16

    key = jax.random.PRNGKey(0)
    k_x, k_w1, k_b1, k_w2, k_b2, k_x2 = jax.random.split(key, 6)

    x = jax.random.normal(k_x, (B, dim1), dtype=jnp.float32)
    w1 = _xavier_normal(k_w1, dim2, dim1).T   # kernel layout: [in, out]
    w2 = _xavier_normal(k_w2, dim4, dim3).T
    b1 = _linear_bias_init(k_b1, dim1, dim2)
    b2 = _linear_bias_init(k_b2, dim3, dim4)

    # Fold once at "parameter-load time" (hoisted out of the forward path).
    w_fold, b_fold = fold_merge_layer_params(w1, b1, w2, b2)

    ref = reference_forward(x, w1, b1, w2, b2)

    out_folded = jax.block_until_ready(merge_layer_tgn_folded(x, w_fold, b_fold))
    out_two = jax.block_until_ready(merge_layer_tgn(x, w1, b1, w2, b2))

    assert out_folded.shape == (B, dim4)
    assert out_two.shape == (B, dim4)
    assert jnp.allclose(out_two, ref, atol=1e-5, rtol=1e-5), \
        "two-matmul kernel mismatch vs reference"
    # Folding reassociates the f32 matmuls; allow a slightly looser tolerance.
    assert jnp.allclose(out_folded, ref, atol=1e-4, rtol=1e-4), \
        "folded kernel mismatch vs reference"

    # Ragged-batch check: B not a multiple of the tile — no batch padding,
    # Pallas masks the partial last block.
    B2 = 40
    x2 = jax.random.normal(k_x2, (B2, dim1), dtype=jnp.float32)
    ref2 = reference_forward(x2, w1, b1, w2, b2)
    out2 = jax.block_until_ready(
        merge_layer_tgn_folded(x2, w_fold, b_fold, tm=16))
    assert out2.shape == (B2, dim4)
    assert jnp.allclose(out2, ref2, atol=1e-4, rtol=1e-4), \
        "ragged-batch folded kernel mismatch vs reference"

    print("KERNEL_OK")
</pallas_src>

<mosaic_0001>
module attributes {stable_mosaic.version = 11 : i64} {
  func.func @_affine_relu_kernel(%arg0: i32, %arg1: memref<16x32xf32, #tpu.memory_space<vmem>>, %arg2: memref<32x16xf32, #tpu.memory_space<vmem>>, %arg3: memref<1x16xf32, #tpu.memory_space<vmem>>, %arg4: memref<16x16xf32, #tpu.memory_space<vmem>>) attributes {dimension_semantics = [#tpu.dimension_semantics<parallel>], iteration_bounds = array<i64: 1>, scalar_prefetch = 0 : i64, scratch_operands = 0 : i64, tpu.core_type = #tpu.core_type<tc>, window_params = [{transform_indices = @transform_0, window_bounds = array<i64: 16, 32>}, {pipeline_mode = #tpu.pipeline_mode<synchronous>, transform_indices = @transform_1, window_bounds = array<i64: 32, 16>}, {pipeline_mode = #tpu.pipeline_mode<synchronous>, transform_indices = @transform_2, window_bounds = array<i64: 1, 16>}, {transform_indices = @transform_3, window_bounds = array<i64: 16, 16>}]} {
    %c0 = arith.constant 0 : index
    %c0_0 = arith.constant 0 : index
    %0 = vector.load %arg1[%c0, %c0_0] : memref<16x32xf32, #tpu.memory_space<vmem>>, vector<16x32xf32>
    %c0_1 = arith.constant 0 : index
    %c0_2 = arith.constant 0 : index
    %1 = vector.load %arg2[%c0_1, %c0_2] : memref<32x16xf32, #tpu.memory_space<vmem>>, vector<32x16xf32>
    %cst = arith.constant dense<0.000000e+00> : vector<16x16xf32>
    %2 = tpu.matmul %0, %1, %cst {dimension_numbers = #tpu.dot_dimension_numbers<[1], [0], [0], [1], [0, 0, 1, 1], [], []>} : vector<16x32xf32>, vector<32x16xf32>, vector<16x16xf32> -> vector<16x16xf32>
    %c0_3 = arith.constant 0 : index
    %c0_4 = arith.constant 0 : index
    %3 = vector.load %arg3[%c0_3, %c0_4] : memref<1x16xf32, #tpu.memory_space<vmem>>, vector<1x16xf32>
    %4 = vector.broadcast %3 : vector<1x16xf32> to vector<16x16xf32>
    %5 = arith.addf %2, %4 : vector<16x16xf32>
    %cst_5 = arith.constant 0.000000e+00 : f32
    %6 = vector.broadcast %cst_5 : f32 to vector<16x16xf32>
    %7 = arith.maximumf %5, %6 : vector<16x16xf32>
    %c0_6 = arith.constant 0 : index
    %c0_7 = arith.constant 0 : index
    %8 = vector.load %arg4[%c0_6, %c0_7] : memref<16x16xf32, #tpu.memory_space<vmem>>, vector<16x16xf32>
    tpu.vector_store %arg4[%c0_6, %c0_7], %7 {strides = array<i32>} : memref<16x16xf32, #tpu.memory_space<vmem>>, vector<16x16xf32>,
    return
  }
  func.func @transform_0(%arg0: i32) -> (i32, i32) {
    %c0_i32 = arith.constant 0 : i32
    %c0_i32_0 = arith.constant 0 : i32
    return %arg0, %c0_i32 : i32, i32
  }
  func.func @transform_1(%arg0: i32) -> (i32, i32) {
    %c0_i32 = arith.constant 0 : i32
    %c0_i32_0 = arith.constant 0 : i32
    %c0_i32_1 = arith.constant 0 : i32
    return %c0_i32, %c0_i32_0 : i32, i32
  }
  func.func @transform_2(%arg0: i32) -> (i32, i32) {
    %c0_i32 = arith.constant 0 : i32
    %c0_i32_0 = arith.constant 0 : i32
    %c0_i32_1 = arith.constant 0 : i32
    return %c0_i32, %c0_i32_0 : i32, i32
  }
  func.func @transform_3(%arg0: i32) -> (i32, i32) {
    %c0_i32 = arith.constant 0 : i32
    %c0_i32_0 = arith.constant 0 : i32
    return %arg0, %c0_i32 : i32, i32
  }
}

</mosaic_0001>

<bundles_post_ra>
// kernel: tpu_custom_call.1
= control target key start
LH: loop header
LB: loop body
LE: loop exit
PB: predicated region body
PF: predicated region fallthrough
CT: control target
= control target key end

     0   :  { %vm28_vm0 = vcmask 261120   ;;  %s223_s0 = inlined_call_operand.vmem [shape: f32[16,32], index: 0, kind: input, shape index: {}]   ;;  %s224_s1 = inlined_call_operand.vmem [shape: f32[32,16], index: 1, kind: input, shape index: {}]   ;;  %s225_s2 = inlined_call_operand.vmem [shape: f32[1,16], index: 2, kind: input, shape index: {}]   ;;  %s226_s3 = inlined_call_operand.hbm [shape: f32[16,16], index: 3, kind: output, shape index: {}]  }
   0x1   :  { %v20_v0 = vld [vmem:[%s224_s1 + $0x18] sm:$0xff]  ;;  %v19_v1 = vld [vmem:[%s224_s1 + $0x10] sm:$0xff]  ;;  %v15_v2 = vld [vmem:[%s223_s0] sm:$0xff] }
   0x2   :  { %140 = vmatprep.subr.mxu0 %v20_v0  ;;  %v18_v3 = vld [vmem:[%s224_s1 + $0x8] sm:$0xff]  ;;  %148 = vmatprep.mubr.msk.f32.mxu0 %vm28_vm0, %v15_v2 }
   0x3   :  { %141 = vmatpush3.msra.mxu0 %v20_v0 }
   0x4   :  { %8 = vsyncpa [#allocation3], 0  ;;  %142 = vmatprep.subr.mxu0 %v19_v1  ;;  %v17_v4 = vld [vmem:[%s224_s1] sm:$0xff]  ;;  %v16_v5 = vld [vmem:[%s223_s0 + $0x8] sm:$0xff]  ;;  %s176_s26 = smov [#allocation2]   ;;  %vm112_vm1 = vcmask 130048  }
   0x5   :  { %143 = vmatpush3.msra.mxu0 %v19_v1  ;;  %v131_v6 = vld [vmem:[%s225_s2] ss:$0 sm:$0xff]  ;;  %s120_s27 = sshll.u32 %s176_s26, 4  ;;  %s121_s27 = int_to_ptr.vmem [resolvable:$true] %s120_s27 }
   0x6   :  { %144 = vmatprep.subr.mxu0 %v18_v3  ;;  %s154_s0 = scalar_lea.vmem %s121_s27, 256  ;;  %p159_p1 = scmp.lt.s32.totalorder %s121_s27, %s121_s27 }
   0x7   :  { %145 = vmatpush3.msra.mxu0 %v18_v3  ;;  %p155_p0 = scmp.ne.s32.totalorder %s121_s27, %s154_s0  ;;  %p160_p2 = scmp.lt.s32.totalorder %s154_s0, %s154_s0 }
   0x8   :  { %146 = vmatprep.subr.mxu0 %v17_v4 }
   0x9   :  { %147 = vmatpush3.msra.mxu0 %v17_v4  ;;  %p161_p3 = por %p160_p2, %p159_p1 }
   0xa   :  { %149 = vmatmul.mubr.msk.f32.vlgmr.msra.gmra.mxu0 %vm28_vm0, %v16_v5 }
   0xb   :  { %p162_p4 = pnand %p161_p3, %p155_p0 }
  0xca   :  { %v150_v7 = vpop.f32.mrf.mxu0 }
  0xcb   :  { %v107_v8 = vadd.f32 %v150_v7, %v131_v6 }
  0xcc   :  { %v101_v9 = vpop.f32.mrf.mxu0 }
  0xcd   :  { %v111_v10 = vmax.f32 %v107_v8, 0.0  ;;  %v102_v11 = vadd.f32 %v131_v6, %v101_v9 }
  0xcf   :  { %114 = vst.msk [vmem:[#allocation2 + $0x8] sm:$0xff] %vm112_vm1, %v111_v10  ;;  %v110_v12 = vmax.f32 %v102_v11, 0.0 }
  0xd1   :  { %113 = vst.msk [vmem:[#allocation2] sm:$0xff] %vm112_vm1, %v110_v12 }
  0xd2   :  { %165 = shalt.err (!%p162_p4)
}
  0xd3   :  { %s177_s1 = smov 128   ;;  %s178_s2 = smov 8  }
  0xd4   :  { %126 = dma.vmem_to_hbm [thread:$0]  %s121_s27, 256, %s226_s3, [#allocation3], %s177_s1, %s177_s1, %s178_s2  }
  0xd5   :  { %174 = dma.done.wait [#allocation3], 256  }
  0xd6   :  { %175 = vsyncadd [#allocation3], 4294967040 }
  0xd7   :  { %130 = vsyncpa [#allocation3], 1 }

</bundles_post_ra>
